<compile_context>
chip_gen: v7x
topology: tpu7x:2x2x1
jax: 0.10.0
libtpu: 0.0.40
codegen_flags: <defaults>
</compile_context>

<pallas_src>
import functools

import jax
import jax.numpy as jnp
from jax.experimental import pallas as pl
from jax.experimental.pallas import tpu as pltpu


def _ceil_to(x, m):
    return ((x + m - 1) // m) * m


@functools.lru_cache(maxsize=None)
def _chip_config():
    """Per-TPU-generation adjacency dtype / tile / VMEM choices."""
    kind = ""
    try:
        kind = jax.devices()[0].device_kind.lower()
    except Exception:
        pass
    single_core = ("lite" in kind) or ("v5e" in kind) or ("v6e" in kind)
    if "v7" in kind:
        # v7x: 64 MiB VMEM, 2 TensorCores, no int8 MXU path -> bf16 counts.
        return dict(adj_dtype=jnp.bfloat16, tile_m=2048, tile_k=2048,
                    vmem_limit=48 * 1024 * 1024, num_cores=2)
    if "v6" in kind or "v5" in kind:
        # v5e/v6e: 128 MiB VMEM, HBM-bound on the A stream -> int8 counts,
        # large tiles to amortize the ~0.35us/step overhead.
        return dict(adj_dtype=jnp.int8, tile_m=2048, tile_k=4096,
                    vmem_limit=96 * 1024 * 1024,
                    num_cores=1 if single_core else 2)
    # Unknown / older chips: conservative bf16 defaults.
    return dict(adj_dtype=jnp.bfloat16, tile_m=2048, tile_k=2048,
                vmem_limit=48 * 1024 * 1024, num_cores=2)


# ----------------------------------------------------------------------------
# Pallas kernel:
#   out[i] = relu?( root[i] + sum_{k,j} deg_inv[k,i] * (counts[k,i,j] @ XW[k,j]) )
# ----------------------------------------------------------------------------
def _rgcn_conv_kernel(root_ref, deginv_ref, a_ref, xw_ref, out_ref, *,
                      apply_relu):
    k = pl.program_id(1)   # edge type        (reduction)
    j = pl.program_id(2)   # src-node tile    (reduction, innermost)

    # Prologue: initialize the resident output tile with the hoisted root/self
    # term.  The output index_map is constant over (k, j), so the tile stays
    # resident in VMEM across the whole reduction.
    @pl.when((k == 0) & (j == 0))
    def _():
        out_ref[...] = root_ref[...]

    # Relational term.  A is streamed as unnormalized counts (int8 on
    # v5e/v6e, bf16 elsewhere); convert on the VPU and feed the bf16 MXU.
    a = a_ref[0]
    if a.dtype != xw_ref.dtype:
        a = a.astype(jnp.float32).astype(xw_ref.dtype)
    part = jnp.dot(a, xw_ref[0], preferred_element_type=jnp.float32)

    # Mean aggregation: fold the per-(edge-type, dst-row) 1/deg in as we go
    # (equivalent to a per-k epilogue, no scratch accumulator needed).
    out_ref[...] += deginv_ref[0] * part

    if apply_relu:
        @pl.when((k == pl.num_programs(1) - 1) &
                 (j == pl.num_programs(2) - 1))
        def _():
            out_ref[...] = jnp.maximum(out_ref[...], 0.0)


def rgcn_conv(x, adj_counts, w_rel, w_root, b_root, node_type, *,
              apply_relu, tile_m=None, tile_k=None):
    """One RGCNConv layer (mean aggregation) with optional fused ReLU.

    x:          (N, Cin)   f32 node features
    adj_counts: (E, N, N)  f32 per-edge-type dst<-src multi-edge counts
    w_rel:      (E, Cin, Cout)  rel_lins weights (no bias)
    w_root:     (T, Cin, Cout)  root_lins weights
    b_root:     (T, Cout)       root_lins biases
    node_type:  (N,) int32
    returns:    (N, Cout) f32
    """
    cfg = _chip_config()
    tile_m = tile_m or cfg["tile_m"]
    tile_k = tile_k or cfg["tile_k"]
    adj_dtype = cfg["adj_dtype"]

    N, Cin = x.shape
    E, _, Cout = w_rel.shape

    # Lane-dense channel padding (Cout = 32 / 1 -> 128): unmasked vst.
    Cp = _ceil_to(Cout, 128)

    # ---- tile selection ----------------------------------------------------
    tm = min(tile_m, _ceil_to(N, 32))        # dst tile (sublanes)
    if cfg["num_cores"] > 1:
        # Keep >= 2 dst tiles so the 'parallel' axis splits across TensorCores.
        tm = min(tm, max(32, _ceil_to(-(-N // 2), 32)))
    tk = min(tile_k, _ceil_to(N, 128))       # src tile (lanes of A)
    Nm = _ceil_to(N, tm)
    Nk = _ceil_to(N, tk)

    # ---- hoisted root/self term (gathered per node, pure XLA) --------------
    root = jnp.einsum('nc,ncd->nd', x, w_root[node_type]) + b_root[node_type]
    root_p = jnp.pad(root, ((0, Nm - N), (0, Cp - Cout))).astype(jnp.float32)

    # ---- hoisted relational projections: one batched bf16 lane-dense matmul
    x_src = jnp.pad(x, ((0, Nk - N), (0, 0))).astype(jnp.bfloat16)
    w_rel_p = jnp.pad(w_rel, ((0, 0), (0, 0),
                              (0, Cp - Cout))).astype(jnp.bfloat16)
    xw_b = jnp.einsum('nc,ecd->end', x_src, w_rel_p,
                      preferred_element_type=jnp.bfloat16)       # (E, Nk, Cp)

    # ---- adjacency stream: UNNORMALIZED counts + streamed 1/deg ------------
    # TODO(synk): int8 (v5e/v6e) requires multi-edge counts <= 127 and bf16
    # (v7x) <= 256 to stay exact; clamp/verify for pathological multigraphs.
    deg = adj_counts.sum(axis=2)                                  # (E, N)
    deg_inv = 1.0 / jnp.maximum(deg, 1.0)
    deg_inv_p = jnp.pad(deg_inv, ((0, 0), (0, Nm - N)))[..., None]  # (E,Nm,1)
    adj_b = jnp.pad(adj_counts,
                    ((0, 0), (0, Nm - N), (0, Nk - N))).astype(adj_dtype)

    grid = (Nm // tm, E, Nk // tk)   # dst tiles parallel, reductions last

    kernel = functools.partial(_rgcn_conv_kernel, apply_relu=apply_relu)

    out = pl.pallas_call(
        kernel,
        out_shape=jax.ShapeDtypeStruct((Nm, Cp), jnp.float32),
        grid_spec=pltpu.PrefetchScalarGridSpec(
            num_scalar_prefetch=0,
            grid=grid,
            in_specs=[
                # root term: constant over (k, j) -> DMA'd once per dst tile.
                pl.BlockSpec((tm, Cp), lambda i, k, j: (i, 0)),
                # per-(edge type, dst row) 1/deg scale (tiny stream).
                pl.BlockSpec((1, tm, 1), lambda i, k, j: (k, i, 0)),
                # adjacency counts tile: the dominant HBM stream.
                # (If xprof still shows exposed DMA after the tile-size bump,
                #  add pipeline_mode=pl.Buffered(3) here.)
                pl.BlockSpec((1, tm, tk), lambda i, k, j: (k, i, j)),
                # projected features tile (bf16).
                pl.BlockSpec((1, tk, Cp), lambda i, k, j: (k, j, 0)),
            ],
            out_specs=pl.BlockSpec((tm, Cp), lambda i, k, j: (i, 0)),
        ),
        compiler_params=pltpu.CompilerParams(
            dimension_semantics=("parallel", "arbitrary", "arbitrary"),
            vmem_limit_bytes=cfg["vmem_limit"],
        ),
    )(root_p, deg_inv_p, adj_b, xw_b)

    return out[:N, :Cout]


# ----------------------------------------------------------------------------
# JAX glue: group_input, dense count adjacency, parameter init, forward
# ----------------------------------------------------------------------------
def group_input(x_dict, emb_dict, node_type, local_node_idx, in_channels):
    N = node_type.shape[0]
    h = jnp.zeros((N, in_channels), jnp.float32)
    for key, xk in x_dict.items():
        mask = node_type == key
        idx = jnp.clip(local_node_idx, 0, xk.shape[0] - 1)
        h = jnp.where(mask[:, None], xk[idx], h)
    for key, emb in emb_dict.items():
        mask = node_type == int(key)
        idx = jnp.clip(local_node_idx, 0, emb.shape[0] - 1)
        h = jnp.where(mask[:, None], emb[idx], h)
    return h


def build_type_adjacency(edge_index, edge_type, num_edge_types, num_nodes):
    """Dense per-edge-type dst<-src multi-edge counts (f32, exact integers).

    TODO(synk): dense (E, N, N) is O(E*N^2) HBM; for MAG-scale subgraphs emit
    block-CSR metadata and drive the src-tile grid axis via scalar-prefetched
    nonzero-block lists so empty A tiles are never DMA'd.
    """
    src, dst = edge_index[0], edge_index[1]
    mats = []
    for t in range(num_edge_types):
        w = (edge_type == t).astype(jnp.float32)
        a = jnp.zeros((num_nodes, num_nodes), jnp.float32).at[dst, src].add(w)
        mats.append(a)
    return jnp.stack(mats)  # (E, N, N)


def init_params(key, in_channels, hidden_channels, num_layers,
                num_nodes_dict, x_types, num_edge_types):
    node_types = list(num_nodes_dict.keys())
    num_node_types = len(node_types)
    params = {"emb": {}, "convs": []}

    # Embeddings for node types without input features (xavier uniform).
    for nt in set(node_types).difference(set(x_types)):
        key, sub = jax.random.split(key)
        bound = (6.0 / (num_nodes_dict[nt] + in_channels)) ** 0.5
        params["emb"][str(nt)] = jax.random.uniform(
            sub, (num_nodes_dict[nt], in_channels), jnp.float32, -bound, bound)

    # Matches the PyTorch module: I->H, (num_layers-1) x H->H, H->1.
    dims = [(in_channels, hidden_channels)]
    dims += [(hidden_channels, hidden_channels)] * (num_layers - 1)
    dims += [(hidden_channels, 1)]
    for (cin, cout) in dims:
        bound = 1.0 / (cin ** 0.5)
        key, k1, k2, k3 = jax.random.split(key, 4)
        params["convs"].append({
            "W_rel": jax.random.uniform(
                k1, (num_edge_types, cin, cout), jnp.float32, -bound, bound),
            "W_root": jax.random.uniform(
                k2, (num_node_types, cin, cout), jnp.float32, -bound, bound),
            "b_root": jax.random.uniform(
                k3, (num_node_types, cout), jnp.float32, -bound, bound),
        })
    return params


def rgcn_forward(params, x_dict, edge_index, edge_type, node_type,
                 local_node_idx, *, in_channels, num_layers, num_edge_types):
    x = group_input(x_dict, params["emb"], node_type, local_node_idx,
                    in_channels)
    N = x.shape[0]
    counts = build_type_adjacency(edge_index, edge_type, num_edge_types, N)

    for i, conv in enumerate(params["convs"]):
        # Mirrors the PyTorch loop exactly: len(convs) == num_layers + 1 and
        # relu/dropout run whenever i != num_layers - 1 (including after the
        # final Cout=1 conv, same as the reference module's forward()).
        apply_relu = (i != num_layers - 1)
        x = rgcn_conv(x, counts, conv["W_rel"], conv["W_root"],
                      conv["b_root"], node_type, apply_relu=apply_relu)
        # TODO(synk): F.dropout is identity here (eval mode); training-mode
        # dropout would use pltpu.prng_seed / pltpu.prng_random_bits.
    return x


def rgcn_forward_reference(params, x_dict, edge_index, edge_type, node_type,
                           local_node_idx, *, in_channels, num_layers,
                           num_edge_types):
    """Pure-XLA f32 reference (same math as the PyTorch module)."""
    x = group_input(x_dict, params["emb"], node_type, local_node_idx,
                    in_channels)
    N = x.shape[0]
    counts = build_type_adjacency(edge_index, edge_type, num_edge_types, N)
    deg_inv = 1.0 / jnp.maximum(counts.sum(axis=2), 1.0)
    for i, conv in enumerate(params["convs"]):
        out = (jnp.einsum('nc,ncd->nd', x, conv["W_root"][node_type])
               + conv["b_root"][node_type])
        for t in range(num_edge_types):
            out = out + deg_inv[t][:, None] * (counts[t] @ (x @ conv["W_rel"][t]))
        if i != num_layers - 1:
            out = jnp.maximum(out, 0.0)
        x = out
    return x


# ----------------------------------------------------------------------------
if __name__ == "__main__":
    key = jax.random.PRNGKey(0)

    in_channels = 32
    hidden_channels = 32
    num_layers = 2
    num_edge_types = 3
    num_nodes_dict = {0: 40, 1: 24}   # type 0 has features, type 1 uses emb
    x_types = [0]

    N = 64          # nodes in the sampled subgraph
    n_edges = 256

    k0, k1, k2, k3 = jax.random.split(key, 4)
    x_dict = {0: jax.random.normal(k0, (num_nodes_dict[0], in_channels),
                                   jnp.float32)}
    node_type = jnp.concatenate([
        jnp.zeros(num_nodes_dict[0], jnp.int32),
        jnp.ones(num_nodes_dict[1], jnp.int32)])
    local_node_idx = jnp.concatenate([
        jnp.arange(num_nodes_dict[0], dtype=jnp.int32),
        jnp.arange(num_nodes_dict[1], dtype=jnp.int32)])
    edge_index = jax.random.randint(k1, (2, n_edges), 0, N, dtype=jnp.int32)
    edge_type = jax.random.randint(k2, (n_edges,), 0, num_edge_types,
                                   dtype=jnp.int32)

    params = init_params(k3, in_channels, hidden_channels, num_layers,
                         num_nodes_dict, x_types, num_edge_types)

    out = rgcn_forward(params, x_dict, edge_index, edge_type, node_type,
                       local_node_idx,
                       in_channels=in_channels, num_layers=num_layers,
                       num_edge_types=num_edge_types)
    out = jax.block_until_ready(out)
    assert out.shape == (N, 1)

    ref = rgcn_forward_reference(params, x_dict, edge_index, edge_type,
                                 node_type, local_node_idx,
                                 in_channels=in_channels,
                                 num_layers=num_layers,
                                 num_edge_types=num_edge_types)
    ref = jax.block_until_ready(ref)
    max_err = float(jnp.max(jnp.abs(out - ref)))
    assert max_err < 1e-1, f"max abs error vs f32 reference: {max_err}"

    print("KERNEL_OK")
</pallas_src>

<mosaic_0001>
module attributes {stable_mosaic.version = 11 : i64} {
  func.func @_rgcn_conv_kernel(%arg0: i32, %arg1: i32, %arg2: i32, %arg3: memref<32x128xf32, #tpu.memory_space<vmem>>, %arg4: memref<1x32x1xf32, #tpu.memory_space<vmem>>, %arg5: memref<1x32x128xbf16, #tpu.memory_space<vmem>>, %arg6: memref<1x128x128xbf16, #tpu.memory_space<vmem>>, %arg7: memref<32x128xf32, #tpu.memory_space<vmem>>) attributes {dimension_semantics = [#tpu.dimension_semantics<parallel>, #tpu.dimension_semantics<arbitrary>, #tpu.dimension_semantics<arbitrary>], iteration_bounds = array<i64: 2, 3, 1>, scalar_prefetch = 0 : i64, scratch_operands = 0 : i64, tpu.core_type = #tpu.core_type<tc>, window_params = [{transform_indices = @transform_0, window_bounds = array<i64: 32, 128>}, {transform_indices = @transform_1, window_bounds = array<i64: 1, 32, 1>}, {transform_indices = @transform_2, window_bounds = array<i64: 1, 32, 128>}, {transform_indices = @transform_3, window_bounds = array<i64: 1, 128, 128>}, {transform_indices = @transform_4, window_bounds = array<i64: 32, 128>}]} {
    %c0_i32 = arith.constant 0 : i32
    %0 = arith.cmpi eq, %arg1, %c0_i32 : i32
    %c0_i32_0 = arith.constant 0 : i32
    %1 = arith.cmpi eq, %arg2, %c0_i32_0 : i32
    %2 = arith.andi %0, %1 : i1
    %3 = arith.extui %2 : i1 to i32
    %c0_i32_1 = arith.constant 0 : i32
    %4 = arith.cmpi ne, %3, %c0_i32_1 : i32
    scf.if %4 {
      %c0_16 = arith.constant 0 : index
      %c0_17 = arith.constant 0 : index
      %22 = vector.load %arg3[%c0_16, %c0_17] : memref<32x128xf32, #tpu.memory_space<vmem>>, vector<32x128xf32>
      %c0_18 = arith.constant 0 : index
      %c0_19 = arith.constant 0 : index
      %23 = vector.load %arg7[%c0_18, %c0_19] : memref<32x128xf32, #tpu.memory_space<vmem>>, vector<32x128xf32>
      tpu.vector_store %arg7[%c0_18, %c0_19], %22 {strides = array<i32>} : memref<32x128xf32, #tpu.memory_space<vmem>>, vector<32x128xf32>,
    } else {
    }
    %c0 = arith.constant 0 : index
    %c0_2 = arith.constant 0 : index
    %c0_3 = arith.constant 0 : index
    %5 = vector.load %arg5[%c0, %c0_2, %c0_3] : memref<1x32x128xbf16, #tpu.memory_space<vmem>>, vector<1x32x128xbf16>
    %6 = vector.shape_cast %5 : vector<1x32x128xbf16> to vector<32x128xbf16>
    %c0_4 = arith.constant 0 : index
    %c0_5 = arith.constant 0 : index
    %c0_6 = arith.constant 0 : index
    %7 = vector.load %arg6[%c0_4, %c0_5, %c0_6] : memref<1x128x128xbf16, #tpu.memory_space<vmem>>, vector<1x128x128xbf16>
    %8 = vector.shape_cast %7 : vector<1x128x128xbf16> to vector<128x128xbf16>
    %cst = arith.constant dense<0.000000e+00> : vector<32x128xf32>
    %9 = tpu.matmul %6, %8, %cst {dimension_numbers = #tpu.dot_dimension_numbers<[1], [0], [0], [1], [0, 0, 1, 1], [], []>} : vector<32x128xbf16>, vector<128x128xbf16>, vector<32x128xf32> -> vector<32x128xf32>
    %c0_7 = arith.constant 0 : index
    %c0_8 = arith.constant 0 : index
    %10 = vector.load %arg7[%c0_7, %c0_8] : memref<32x128xf32, #tpu.memory_space<vmem>>, vector<32x128xf32>
    %c0_9 = arith.constant 0 : index
    %c0_10 = arith.constant 0 : index
    %c0_11 = arith.constant 0 : index
    %11 = vector.load %arg4[%c0_9, %c0_10, %c0_11] : memref<1x32x1xf32, #tpu.memory_space<vmem>>, vector<1x32x1xf32>
    %12 = vector.shape_cast %11 : vector<1x32x1xf32> to vector<32x1xf32>
    %13 = vector.broadcast %12 : vector<32x1xf32> to vector<32x128xf32>
    %14 = arith.mulf %13, %9 : vector<32x128xf32>
    %15 = arith.addf %10, %14 : vector<32x128xf32>
    %c0_12 = arith.constant 0 : index
    %c0_13 = arith.constant 0 : index
    %16 = vector.load %arg7[%c0_12, %c0_13] : memref<32x128xf32, #tpu.memory_space<vmem>>, vector<32x128xf32>
    tpu.vector_store %arg7[%c0_12, %c0_13], %15 {strides = array<i32>} : memref<32x128xf32, #tpu.memory_space<vmem>>, vector<32x128xf32>,
    %c2_i32 = arith.constant 2 : i32
    %17 = arith.cmpi eq, %arg1, %c2_i32 : i32
    %c0_i32_14 = arith.constant 0 : i32
    %18 = arith.cmpi eq, %arg2, %c0_i32_14 : i32
    %19 = arith.andi %17, %18 : i1
    %20 = arith.extui %19 : i1 to i32
    %c0_i32_15 = arith.constant 0 : i32
    %21 = arith.cmpi ne, %20, %c0_i32_15 : i32
    scf.if %21 {
      %c0_16 = arith.constant 0 : index
      %c0_17 = arith.constant 0 : index
      %22 = vector.load %arg7[%c0_16, %c0_17] : memref<32x128xf32, #tpu.memory_space<vmem>>, vector<32x128xf32>
      %cst_18 = arith.constant 0.000000e+00 : f32
      %23 = vector.broadcast %cst_18 : f32 to vector<32x128xf32>
      %24 = arith.maximumf %22, %23 : vector<32x128xf32>
      %c0_19 = arith.constant 0 : index
      %c0_20 = arith.constant 0 : index
      %25 = vector.load %arg7[%c0_19, %c0_20] : memref<32x128xf32, #tpu.memory_space<vmem>>, vector<32x128xf32>
      tpu.vector_store %arg7[%c0_19, %c0_20], %24 {strides = array<i32>} : memref<32x128xf32, #tpu.memory_space<vmem>>, vector<32x128xf32>,
    } else {
    }
    return
  }
  func.func @transform_0(%arg0: i32, %arg1: i32, %arg2: i32) -> (i32, i32) {
    %c0_i32 = arith.constant 0 : i32
    %c0_i32_0 = arith.constant 0 : i32
    return %arg0, %c0_i32 : i32, i32
  }
  func.func @transform_1(%arg0: i32, %arg1: i32, %arg2: i32) -> (i32, i32, i32) {
    %c0_i32 = arith.constant 0 : i32
    %c0_i32_0 = arith.constant 0 : i32
    return %arg1, %arg0, %c0_i32 : i32, i32, i32
  }
  func.func @transform_2(%arg0: i32, %arg1: i32, %arg2: i32) -> (i32, i32, i32) {
    %c0_i32 = arith.constant 0 : i32
    return %arg1, %arg0, %arg2 : i32, i32, i32
  }
  func.func @transform_3(%arg0: i32, %arg1: i32, %arg2: i32) -> (i32, i32, i32) {
    %c0_i32 = arith.constant 0 : i32
    %c0_i32_0 = arith.constant 0 : i32
    return %arg1, %arg2, %c0_i32 : i32, i32, i32
  }
  func.func @transform_4(%arg0: i32, %arg1: i32, %arg2: i32) -> (i32, i32) {
    %c0_i32 = arith.constant 0 : i32
    %c0_i32_0 = arith.constant 0 : i32
    return %arg0, %c0_i32 : i32, i32
  }
}

</mosaic_0001>

<bundles_post_ra>
// kernel: tpu_custom_call.1
= control target key start
LH: loop header
LB: loop body
LE: loop exit
PB: predicated region body
PF: predicated region fallthrough
CT: control target
= control target key end

     0   :  { %s1510_s0 = inlined_call_operand.hbm [shape: f32[64,128], index: 0, kind: input, shape index: {}]   ;;  %s1511_s1 = inlined_call_operand.vmem [shape: f32[3,64,1], index: 1, kind: input, shape index: {}]   ;;  %s1512_s2 = inlined_call_operand.hbm [shape: bf16[3,64,128], index: 2, kind: input, shape index: {}]   ;;  %s1513_s3 = inlined_call_operand.vmem [shape: bf16[3,128,128], index: 3, kind: input, shape index: {}]   ;;  %s1514_s4 = inlined_call_operand.hbm [shape: f32[64,128], index: 4, kind: output, shape index: {}]  }
   0x1   :  { %1528 = sst [smem:[#allocation17_spill]] %s1510_s0 }
   0x2   :  { %1529 = sst [smem:[#allocation18_spill]] %s1511_s1 }
   0x3   :  { %1530 = sst [smem:[#allocation19_spill]] %s1513_s3 }
   0x4   :  { %1531 = sst [smem:[#allocation20_spill]] %s1514_s4 }
   0x5   :  { %9 = vsyncpa [#allocation3], 0 }
   0x6   :  { %11 = vsyncpa [#allocation3 + $0x1], 0 }
   0x7   :  { %12 = vsyncpa [#allocation6], 0 }
   0x8   :  { %14 = vsyncpa [#allocation6 + $0x1], 0 }
   0x9   :  { %15 = vsyncpa [#allocation4], 0 }
   0xa   :  { %17 = vsyncpa [#allocation4 + $0x1], 0  ;;  %s1143_s15 = smov 0   ;;  %s1145_s16 = smov 0  }
   0xb   :  { %s1147_s17 = smov 0   ;;  %s1149_s18 = smov 0  }
   0xc   :  { %s1151_s19 = smov 0   ;;  %s1153_s20 = smov 0  }
   0xd   :  { %s1155_s21 = smov 0   ;;  %s1157_s22 = smov 0  }
   0xe   :  { %s1159_s23 = smov 0   ;;  %s1161_s24 = smov 0  }
   0xf   :  { %s1163_s25 = smov 0  }
  0x10 LB: > { %1532 = sst [smem:[#allocation11_spill]] %s1078_s18  ;;  %s722_s26 = sadd.s32 4294967295, %s1106_s25   ;;  %s1106_s25 = sphi %s1163_s25, %s23_s25   ;;  %s1102_s24 = sphi %s1161_s24, %s1577_s24   ;;  %s1098_s23 = sphi %s1159_s23, %s1576_s23   ;;  %s1094_s22 = sphi %s1157_s22, %s1575_s22   ;;  %s1090_s21 = sphi %s1155_s21, %s1574_s21   ;;  %s1086_s20 = sphi %s1153_s20, %s1573_s20   ;;  %s1082_s19 = sphi %s1151_s19, %s1572_s19   ;;  %s1078_s18 = sphi %s1149_s18, %s1571_s18   ;;  %s1074_s17 = sphi %s1147_s17, %s1570_s17   ;;  %s1070_s16 = sphi %s1145_s16, %s1569_s16   ;;  %s1066_s15 = sphi %s1143_s15, %s1568_s15  }
  0x11   : > { %1533 = sst [smem:[#allocation12_spill]] %s1090_s21  ;;  %s723_s27 = sadd.s32 4294967294, %s1106_s25  }
  0x12   : > { %1534 = sst [smem:[#allocation13_spill]] %s1094_s22  ;;  %p56_p0 = scmp.ne.s32.totalorder %s1086_s20, %s1082_s19 }
  0x13   : > { %p1516_p1 = scmp.eq.s32.totalorder %s1106_s25, 0  ;;  %p62_p2 = scmp.ne.s32.totalorder %s1082_s19, %s1078_s18 }
  0x14   : > { %p1207_p3 = scmp.eq.s32.totalorder %s722_s26, 0  ;;  %p172_p5 = scmp.eq.s32.totalorder %s722_s26, 5 }
  0x15   : > { %p1213_p4 = por %p1516_p1, %p56_p0  ;;  %p178_p7 = scmp.eq.s32.totalorder %s723_s27, 5 }
  0x16   : > { %p1219_p6 = por %p1207_p3, %p62_p2  ;;  %p1223_p8 = por %p172_p5, %p56_p0 }
  0x17   : > { %p1227_p9 = por %p178_p7, %p62_p2  ;;  %p1515_p10 = scmp.lt.s32.totalorder %s1106_s25, 6 }
  0x18   : > { %s1537_s6 = scalar_select %p1219_p6, 1, 0 }
  0x19   : > { %s1538_s7 = scalar_select %p1223_p8, 1, 0 }
  0x1a   : > { %s1540_s8 = scalar_select %p1227_p9, 1, 0 }
  0x1b   : > { %1539 = sst [smem:[#allocation14_spill]] %s1538_s7  ;;  %s198_s9 = sand.u32 1, %s1086_s20  }
  0x1c   : > { %1541 = sst [smem:[#allocation15_spill]] %s1540_s8  ;;  %s759_s10 = sshll.u32 %s1102_s24, 9 }
  0x1d   : > { %s726_s11 = sshll.u32 %s198_s9, 5  ;;  %s1542_s0 = sld [smem:[#allocation17_spill]] }
  0x1e   : > { %s202_s26 = scalar_lea.vmem [#allocation2], %s726_s11  ;;  %p1243_p11 = pnand %p1515_p10, %p1213_p4 }
  0x1f   : > { %s209_s27 = sshll.u32 %s202_s26, 4  ;;  %s1249_s28 = scalar_lea.sflag [#allocation3], %s198_s9  ;;  %s1247_s27 = int_to_ptr.vmem [resolvable:$true] %s209_s27 }
  0x20   : > { %p922_p13 = pneg %p1243_p11 }
  0x23   : > { %s1237_s14 = scalar_lea.hbm %s1542_s0, %s759_s10  ;;  %s925_s12 = scalar_lea.hbm %s1542_s0, 1024 }
  0x24   : > { %s920_s10 = scalar_lea.hbm %s1237_s14, 512  ;;  %p926_p4 = scmp.lt.u32.totalorder %s1237_s14, %s1542_s0 }
  0x25   : > { %p921_p12 = scmp.ne.s32.totalorder %s1237_s14, %s920_s10  ;;  %p927_p5 = scmp.lt.u32.totalorder %s925_s12, %s920_s10 }
  0x26   : > { %p929_p10 = scmp.lt.u32.totalorder %s920_s10, %s1237_s14 }
  0x27   : > { %p923_p0 = pnand %p922_p13, %p921_p12  ;;  %p928_p7 = por %p927_p5, %p926_p4 }
  0x29   : > { %p924_p2 = pneg %p923_p0  ;;  %p930_p1 = por %p929_p10, %p928_p7 }
  0x2b   : > { %p931_p9 = pnand %p930_p1, %p924_p2 }
  0x2d   : > { %934 = shalt.err (!%p931_p9)
}
  0x2e   : > { %s935_s9 = scalar_lea.vmem %s1247_s27, 512  ;;  %s1108_s5 = smov [#allocation2]  }
  0x2f   : > { %p936_p12 = scmp.ne.s32.totalorder %s1247_s27, %s935_s9  ;;  %s940_s11 = sshll.u32 %s1108_s5, 4  ;;  %s941_s11 = int_to_ptr.vmem [resolvable:$false] %s940_s11 }
  0x30   : > { %s942_s13 = scalar_lea.vmem %s941_s11, 1024  ;;  %p943_p6 = scmp.lt.s32.totalorder %s1247_s27, %s941_s11 }
  0x31   : > { %p938_p0 = pnand %p936_p12, %p922_p13  ;;  %p944_p4 = scmp.lt.s32.totalorder %s942_s13, %s935_s9 }
  0x33   : > { %p939_p8 = pneg %p938_p0  ;;  %p945_p5 = por %p944_p4, %p943_p6 }
  0x35   : > { %p946_p10 = pnand %p945_p5, %p939_p8 }
  0x37   : > { %949 = shalt.err (!%p946_p10)
}
  0x38   : > { %s1109_s10 = smov 128   ;;  %s1110_s12 = smov 8  }
  0x39   : > { %803 = dma.hbm_to_vmem [thread:$0]  (!%p1243_p11), %s1237_s14, 512, %s1247_s27, %s1249_s28, %s1109_s10, %s1109_s10, %s1110_s12  }
  0x3a   : > { %p733_p1 = scmp.ge.s32.totalorder %s1106_s25, 1  ;;  %p267_p6 = scmp.lt.s32.totalorder %s1106_s25, 7 }
  0x3b   : > { %s38_s9 = sadd.s32 1, %s1098_s23  ;;  %s107_s5 = sadd.s32 1, %s1074_s17 }
  0x3c   : > { %p1279_p8 = pnand %p733_p1, %p267_p6  ;;  %p40_p9 = scmp.ge.s32.totalorder %s38_s9, 3 }
  0x3d   : > { %p114_p13 = scmp.ne.s32.totalorder %s1074_s17, %s1070_s16  ;;  %p120_p2 = scmp.ne.s32.totalorder %s1070_s16, %s1066_s15 }
  0x3e   : > { %s1579_s9 = smov (%p40_p9, %s38_s9), 0  ;;  %s1546_s29 = sadd.s32 1, %s1102_s24 }
  0x3f   : > { %1545 = sst [smem:[#allocation16_spill]] %s1579_s9  ;;  %s1581_s29 = smov (!%p40_p9, %s1546_s29), %s1102_s24 }
  0x40   : > { %s100_s28 = ssub.s32 %s1098_s23, %s1579_s9  ;;  %p1547_p11 = scmp.eq.s32.totalorder %s1106_s25, 0 }
  0x41   : > { %p44_p12 = scmp.ge.s32.totalorder %s1581_s29, 2  ;;  %p1304_p0 = por %p120_p2, %p1207_p3 }
  0x42   : > { %p1298_p7 = por %p114_p13, %p1547_p11  ;;  %s232_s15 = sand.u32 1, %s1074_s17  }
  0x43   : > { %s1549_s27 = scalar_select %p1304_p0, 1, 0 }
  0x44   : > { %s730_s11 = sshll.u32 %s1102_s24, 2  ;;  %s1583_s29 = smov (%p44_p12, %s1581_s29), 0 }
  0x45   : > { %s729_s13 = sshll.u32 %s232_s15, 4  ;;  %s46_s10 = ssub.s32 %s1102_s24, %s1583_s29 }
  0x46   : > { %p47_p4 = scmp.eq.s32.totalorder %s46_s10, 0  ;;  %s102_s12 = sor.u32 %s100_s28, %s46_s10 }
  0x47   : > { %p105_p5 = scmp.eq.s32.totalorder %s102_s12, 0  ;;  %s731_s0 = sshll.u32 %s1098_s23, 3 }
  0x48   : > { %s1550_s9 = sadd.s32 1, %s1086_s20  ;;  %s243_s18 = sadd.s32 %s731_s0, %s730_s11 }
  0x49   : > { %s1318_s8 = scalar_select %p47_p4, %s1086_s20, %s1550_s9  }
  0x4a   : > { %s1321_s30 = scalar_select %p105_p5, %s1074_s17, %s107_s5  }
  0x4b   : > { %s236_s4 = scalar_lea.vmem [#allocation5], %s729_s13  ;;  %s732_s1 = sshll.u32 %s243_s18, 6 }
  0x4c   : > { %s246_s7 = sshll.u32 %s236_s4, 4  ;;  %s1328_s22 = scalar_lea.hbm %s1512_s2, %s732_s1  ;;  %s1323_s7 = int_to_ptr.vmem [resolvable:$true] %s246_s7 }
  0x4d   : > { %p1551_p3 = scmp.lt.s32.totalorder %s1106_s25, 6  ;;  %s1338_s0 = scalar_lea.sflag [#allocation6], %s232_s15 }
  0x4e   : > { %s950_s4 = scalar_lea.hbm %s1328_s22, 256  ;;  %s955_s18 = scalar_lea.hbm %s1512_s2, 1536 }
  0x4f   : > { %p1334_p10 = pnand %p1551_p3, %p1298_p7  ;;  %p951_p1 = scmp.ne.s32.totalorder %s1328_s22, %s950_s4 }
  0x50   : > { %p956_p2 = scmp.lt.u32.totalorder %s1328_s22, %s1512_s2  ;;  %p957_p11 = scmp.lt.u32.totalorder %s955_s18, %s950_s4 }
  0x51   : > { %p952_p6 = pneg %p1334_p10  ;;  %p959_p12 = scmp.lt.u32.totalorder %s950_s4, %s1328_s22 }
  0x52   : > { %p958_p7 = por %p957_p11, %p956_p2 }
  0x53   : > { %p953_p9 = pnand %p952_p6, %p951_p1 }
  0x54   : > { %p960_p4 = por %p959_p12, %p958_p7 }
  0x55   : > { %p954_p13 = pneg %p953_p9 }
  0x57   : > { %p961_p5 = pnand %p960_p4, %p954_p13 }
  0x59   : > { %964 = shalt.err (!%p961_p5)
}
  0x5a   : > { %s965_s28 = scalar_lea.vmem %s1323_s7, 256  ;;  %s1111_s14 = smov [#allocation5]  }
  0x5b   : > { %p966_p3 = scmp.ne.s32.totalorder %s1323_s7, %s965_s28  ;;  %s970_s15 = sshll.u32 %s1111_s14, 4  ;;  %s971_s15 = int_to_ptr.vmem [resolvable:$false] %s970_s15 }
  0x5c   : > { %s972_s11 = scalar_lea.vmem %s971_s15, 512  ;;  %p973_p0 = scmp.lt.s32.totalorder %s1323_s7, %s971_s15 }
  0x5d   : > { %p968_p1 = pnand %p966_p3, %p952_p6  ;;  %p974_p2 = scmp.lt.s32.totalorder %s972_s11, %s965_s28 }
  0x5f   : > { %p969_p9 = pneg %p968_p1  ;;  %p975_p11 = por %p974_p2, %p973_p0 }
  0x61   : > { %p976_p7 = pnand %p975_p11, %p969_p9 }
  0x63   : > { %979 = shalt.err (!%p976_p7)
}
  0x64   : > { %s1112_s13 = smov 64   ;;  %s1113_s10 = smov 4  }
  0x65   : > { %806 = dma.hbm_to_vmem [thread:$0]  (!%p1334_p10), %s1328_s22, 256, %s1323_s7, %s1338_s0, %s1112_s13, %s1112_s13, %s1113_s10  }
  0x66   : > { %271 = sbr.rel (%p1279_p8) target bundleno = 425 (0x1a9), region = 36  ;;  %s1369_s12 = sand.u32 (!%p1279_p8), 1, %s1082_s19  }
  0x67   : > { %s734_s4 = sshll.u32 (!%p1279_p8), %s1369_s12, 5  ;;  %s274_s1 = scalar_lea.sflag (!%p1279_p8), [#allocation3], %s1369_s12 }
  0x68   : > { %s277_s3 = scalar_lea.vmem (!%p1279_p8), [#allocation2], %s734_s4  ;;  %p1553_p0 = scmp.ne.s32.totalorder (!%p1279_p8), %s1537_s6, 0 }
  0x6d   : > { %1053 = dma.done.wait (%p1553_p0), %s274_s1, 512  }
  0x6e   : > { %1055 = vsyncadd (%p1553_p0), %s274_s1, 4294966784  ;;  %s282_s22 = sand.u32 1, %s1070_s16   ;;  %p1554_p8 = scmp.ne.s32.totalorder %s1549_s27, 0 }
  0x6f   : > { %s1378_s7 = sshll.u32 %s282_s22, 4  ;;  %s283_s26 = scalar_lea.sflag [#allocation6], %s282_s22 }
  0x70   : > { %s286_s9 = scalar_lea.vmem [#allocation5], %s1378_s7 }
  0x71   : > { %1057 = dma.done.wait (%p1554_p8), %s283_s26, 256  }
  0x72   : > { %1059 = vsyncadd (%p1554_p8), %s283_s26, 4294967040  ;;  %s1555_s0 = sld [smem:[#allocation13_spill]]  ;;  %s1556_s18 = sld [smem:[#allocation12_spill]] }
  0x73   : > { %s1557_s11 = sld [smem:[#allocation19_spill]]  ;;  %s1558_s22 = sld [smem:[#allocation18_spill]] }
  0x78   : > { %s737_s21 = sshll.u32 %s1555_s0, 2  ;;  %p336_p10 = scmp.lt.s32.totalorder %s1556_s18, 2 }
  0x79   : > { %p338_p6 = scmp.lt.s32.totalorder %s737_s21, 7  ;;  %p358_p13 = scmp.eq.s32.totalorder %s1556_s18, 0 }
  0x7a   : > { %s1585_s18 = smov (!%p336_p10, %s1556_s18), 2  ;;  %s1399_s0 = scalar_lea.vmem [#allocation7], %s734_s4  ;;  %v364_v0 = vld [vmem:[%s277_s3] sm:$0xff] (%p358_p13)  ;;  %v365_v1 = vld [vmem:[%s277_s3 + $0x8] sm:$0xff] (%p358_p13)  ;;  %v366_v2 = vld [vmem:[%s277_s3 + $0x10] sm:$0xff] (%p358_p13) }
  0x7b   : > { %s1587_s21 = smov (!%p338_p6, %s737_s21), 7  ;;  %s738_s6 = sshll.u32 %s1585_s18, 3  ;;  %368 = vst [vmem:[%s1399_s0] sm:$0xff] (%p358_p13), %v364_v0  ;;  %369 = vst [vmem:[%s1399_s0 + $0x8] sm:$0xff] (%p358_p13), %v365_v1  ;;  %v367_v3 = vld [vmem:[%s277_s3 + $0x18] sm:$0xff] (%p358_p13) }
  0x7c   : > { %s760_s5 = sshll.u32 %s1585_s18, 6  ;;  %s341_s28 = sadd.s32 %s738_s6, %s1587_s21  ;;  %370 = vst [vmem:[%s1399_s0 + $0x10] sm:$0xff] (%p358_p13), %v366_v2  ;;  %371 = vst [vmem:[%s1399_s0 + $0x18] sm:$0xff] (%p358_p13), %v367_v3 }
  0x7d   : > { %s1392_s13 = scalar_lea.vmem %s1557_s11, %s760_s5  ;;  %s739_s27 = sshll.u32 %s341_s28, 3 }
  0x7e   : > { %s1397_s26 = scalar_lea.vmem %s1558_s22, %s739_s27  ;;  %363 = sbr.rel (!%p358_p13) target bundleno = 133 (0x85), region = 48 }
  0x85 PF: > { %v910_v4 = vld [vmem:[%s1392_s13] sm:$0xff]   ;;  %v911_v5 = vld [vmem:[%s1392_s13 + $0x8] sm:$0xff]   ;;  %v1114_v6 = vmov 0   ;;  %v912_v7 = vld [vmem:[%s1392_s13 + $0x10] sm:$0xff]   ;;  %s1559_s4 = sld [smem:[#allocation12_spill]] }
  0x86   : > { %909 = vset.pattern.permute.xlu1 %v1114_v6  ;;  %908 = vset.pattern.permute.xlu0 %v1114_v6  ;;  %v913_v8 = vld [vmem:[%s1392_s13 + $0x18] sm:$0xff]   ;;  %v918_v9 = vld [vmem:[%s286_s9] sm:$0xff]   ;;  %v506_v14 = vld [vmem:[%s1397_s26 + $0x8] sm:$0xff] }
  0x87   : > { %774 = vmatprep.subr.bf16.mxu0 %v910_v4  ;;  %790 = vmatprep.mubr.bf16.mxu0 %v918_v9  ;;  %v507_v10 = vld [vmem:[%s1397_s26 + $0x10] sm:$0xff]  ;;  %v505_v11 = vld [vmem:[%s1397_s26] sm:$0xff]  ;;  %v508_v13 = vld [vmem:[%s1397_s26 + $0x18] sm:$0xff] }
  0x88   : > { %775 = vmatpush3.bf16.msra.mxu0 %v910_v4  ;;  %521 = vperm.xlu1 %909, %v507_v10   ;;  %v914_v12 = vld [vmem:[%s1392_s13 + $0x20] sm:$0xff]   ;;  %v915_v15 = vld [vmem:[%s1392_s13 + $0x28] sm:$0xff]   ;;  %v916_v16 = vld [vmem:[%s1392_s13 + $0x30] sm:$0xff]  }
  0x89   : > { %776 = vmatprep.subr.bf16.mxu0 %v911_v5  ;;  %511 = vperm.xlu0 %908, %v505_v11   ;;  %v917_v17 = vld [vmem:[%s1392_s13 + $0x38] sm:$0xff]   ;;  %v503_v22 = vld [vmem:[%s1399_s0 + $0x10] sm:$0xff]  ;;  %v501_v25 = vld [vmem:[%s1399_s0] sm:$0xff] }
  0x8a   : > { %v919_v18 = vld [vmem:[%s286_s9 + $0x8] sm:$0xff]  }
  0x8b   : > { %p541_p12 = scmp.eq.s32.totalorder %s1559_s4, 2  ;;  %v504_v29 = vld [vmem:[%s1399_s0 + $0x18] sm:$0xff]  ;;  %v502_v34 = vld [vmem:[%s1399_s0 + $0x8] sm:$0xff] }
  0x8c   : > { %777 = vmatpush3.bf16.msra.mxu0 %v911_v5  ;;  %526 = vperm.xlu1 %909, %v508_v13  }
  0x8d   : > { %778 = vmatprep.subr.bf16.mxu0 %v912_v7  ;;  %516 = vperm.xlu0 %908, %v506_v14  }
  0x90   : > { %779 = vmatpush3.bf16.msra.mxu0 %v912_v7 }
  0x91   : > { %780 = vmatprep.subr.bf16.mxu0 %v913_v8 }
  0x94   : > { %781 = vmatpush3.bf16.msra.mxu0 %v913_v8 }
  0x95   : > { %782 = vmatprep.subr.bf16.mxu0 %v914_v12 }
  0x98   : > { %783 = vmatpush3.bf16.msra.mxu0 %v914_v12 }
  0x99   : > { %784 = vmatprep.subr.bf16.mxu0 %v915_v15 }
  0x9c   : > { %785 = vmatpush3.bf16.msra.mxu0 %v915_v15 }
  0x9d   : > { %786 = vmatprep.subr.bf16.mxu0 %v916_v16 }
  0xa0   : > { %787 = vmatpush3.bf16.msra.mxu0 %v916_v16 }
  0xa1   : > { %788 = vmatprep.subr.bf16.mxu0 %v917_v17 }
  0xa4   : > { %789 = vmatpush3.bf16.msra.mxu0 %v917_v17 }
  0xa7   : > { %791 = vmatmul.mubr.bf16.vlgmr.msra.gmra.mrb[0].mxu0 %v919_v18 }
 0x107   : > { %v522_v19 = vpop.permute.xlu1 %521 }
 0x108   : > { %v512_v20 = vpop.permute.xlu0 %511 }
 0x10b   : > { %v527_v26 = vpop.permute.xlu1 %526 }
 0x10c   : > { %v517_v30 = vpop.permute.xlu0 %516 }
 0x17a   : > { %v792_v21 = vpop.f32.mrb[0].mxu0 }
 0x17b   : > { %v531_v23 = vmul.f32 %v792_v21, %v522_v19  ;;  %v486_v24 = vpop.f32.mrb[1].mxu0 }
 0x17c   : > { %v529_v27 = vmul.f32 %v512_v20, %v486_v24  ;;  %v793_v28 = vpop.f32.mrb[2].mxu0  ;;  %545 = sbr.rel (!%p541_p12) target bundleno = 397 (0x18d), region = 52 }
 0x17d   : > { %v535_v31 = vadd.f32 %v531_v23, %v503_v22  ;;  %v532_v32 = vmul.f32 %v793_v28, %v527_v26  ;;  %v489_v33 = vpop.f32.mrb[3].mxu0 }
 0x17e   : > { %v533_v35 = vadd.f32 %v529_v27, %v501_v25  ;;  %v530_v36 = vmul.f32 %v517_v30, %v489_v33 }
 0x17f   : > { %539 = vst [vmem:[%s1399_s0 + $0x10] sm:$0xff] %v535_v31  ;;  %v536_v37 = vadd.f32 %v532_v32, %v504_v29 }
 0x180   : > { %537 = vst [vmem:[%s1399_s0] sm:$0xff] %v533_v35  ;;  %v534_v38 = vadd.f32 %v530_v36, %v502_v34 }
 0x181   : > { %540 = vst [vmem:[%s1399_s0 + $0x18] sm:$0xff] %v536_v37 }
 0x182   : > { %538 = vst [vmem:[%s1399_s0 + $0x8] sm:$0xff] %v534_v38 }
 0x186   : > { %v548_v41 = vld [vmem:[%s1399_s0 + $0x10] sm:$0xff] }
 0x187   : > { %v546_v39 = vld [vmem:[%s1399_s0] sm:$0xff]  ;;  %v552_v44 = vmax.f32 %v548_v41, 0.0 }
 0x188   : > { %v550_v42 = vmax.f32 %v546_v39, 0.0  ;;  %v549_v45 = vld [vmem:[%s1399_s0 + $0x18] sm:$0xff] }
 0x189   : > { %v547_v40 = vld [vmem:[%s1399_s0 + $0x8] sm:$0xff]  ;;  %v553_v46 = vmax.f32 %v549_v45, 0.0  ;;  %556 = vst [vmem:[%s1399_s0 + $0x10] sm:$0xff] %v552_v44 }
 0x18a   : > { %v551_v43 = vmax.f32 %v547_v40, 0.0  ;;  %554 = vst [vmem:[%s1399_s0] sm:$0xff] %v550_v42 }
 0x18b   : > { %557 = vst [vmem:[%s1399_s0 + $0x18] sm:$0xff] %v553_v46 }
 0x18c   : > { %555 = vst [vmem:[%s1399_s0 + $0x8] sm:$0xff] %v551_v43 }
 0x18d PF: > { %s1560_s3 = sld [smem:[#allocation13_spill]]  ;;  %s1561_s7 = sld [smem:[#allocation14_spill]] }
 0x18e   : > { %s1562_s6 = sld [smem:[#allocation20_spill]]  ;;  %s572_s28 = sshll.u32 %s1399_s0, 4  ;;  %s1447_s28 = int_to_ptr.vmem [resolvable:$true] %s572_s28 }
 0x18f   : > { %s559_s14 = scalar_lea.sflag [#allocation4], %s1369_s12  ;;  %s980_s15 = scalar_lea.vmem %s1447_s28, 512 }
 0x190   : > { %p981_p4 = scmp.ne.s32.totalorder %s1447_s28, %s980_s15  ;;  %s1115_s11 = smov [#allocation7]  }
 0x191   : > { %s984_s13 = sshll.u32 %s1115_s11, 4  ;;  %s985_s13 = int_to_ptr.vmem [resolvable:$false] %s984_s13 }
 0x192   : > { %s986_s27 = scalar_lea.vmem %s985_s13, 1024  ;;  %p987_p9 = scmp.lt.s32.totalorder %s1447_s28, %s985_s13 }
 0x193   : > { %s763_s9 = sshll.u32 %s1560_s3, 9  ;;  %p1563_p5 = scmp.ne.s32.totalorder %s1561_s7, 0 }
 0x194   : > { %s1444_s5 = scalar_lea.hbm %s1562_s6, %s763_s9  ;;  %p988_p2 = scmp.lt.s32.totalorder %s986_s27, %s980_s15 }
 0x195   : > { %p982_p3 = pnand %p981_p4, %p1563_p5 }
 0x196   : > { %p989_p11 = por %p988_p2, %p987_p9 }
 0x197   : > { %p983_p1 = pneg %p982_p3 }
 0x199   : > { %p990_p7 = pnand %p989_p11, %p983_p1 }
 0x19b   : > { %993 = shalt.err (!%p990_p7)
}
 0x19c   : > { %s994_s10 = scalar_lea.hbm %s1444_s5, 512  ;;  %s998_s26 = scalar_lea.hbm %s1562_s6, 1024 }
 0x19d   : > { %p995_p0 = scmp.ne.s32.totalorder %s1444_s5, %s994_s10  ;;  %p999_p6 = scmp.lt.u32.totalorder %s1444_s5, %s1562_s6 }
 0x19e   : > { %p1000_p13 = scmp.lt.u32.totalorder %s998_s26, %s994_s10  ;;  %p1002_p4 = scmp.lt.u32.totalorder %s994_s10, %s1444_s5 }
 0x19f   : > { %p996_p8 = pnand %p995_p0, %p1563_p5 }
 0x1a0   : > { %p1001_p12 = por %p1000_p13, %p999_p6 }
 0x1a1   : > { %p997_p10 = pneg %p996_p8 }
 0x1a2   : > { %p1003_p3 = por %p1002_p4, %p1001_p12 }
 0x1a4   : > { %p1004_p1 = pnand %p1003_p3, %p997_p10 }
 0x1a6   : > { %1007 = shalt.err (!%p1004_p1)
}
 0x1a7   : > { %s1116_s3 = smov 128   ;;  %s1117_s9 = smov 8  }
 0x1a8   : > { %798 = dma.vmem_to_hbm [thread:$0]  (%p1563_p5), %s1447_s28, 512, %s1444_s5, %s559_s14, %s1116_s3, %s1116_s3, %s1117_s9  }
 0x1a9 PF: > { %s1564_s18 = sld [smem:[#allocation11_spill]]  ;;  %s1565_s21 = sld [smem:[#allocation15_spill]] }
 0x1aa   : > { %p812_p9 = scmp.ge.s32.totalorder %s1106_s25, 2 }
 0x1af   : > { %s587_s15 = sand.u32 1, %s1564_s18   ;;  %p1566_p2 = scmp.ne.s32.totalorder %s1565_s21, 0 }
 0x1b0   : > { %s588_s11 = scalar_lea.sflag [#allocation4], %s587_s15 }
 0x1b1   : > { %p808_p11 = pnand %p812_p9, %p1566_p2 }
 0x1b3   : > { %1061 = dma.done.wait (!%p808_p11), %s588_s11, 512  }
 0x1b4   : > { %1063 = vsyncadd (!%p808_p11), %s588_s11, 4294966784  ;;  %s23_s25 = sadd.s32 1, %s1106_s25   ;;  %s1567_s12 = sld [smem:[#allocation16_spill]] }
 0x1b5   : > { %p20_p7 = scmp.ge.s32.totalorder %s23_s25, 8   ;;  %s1568_s15 = smov %s1070_s16 }
 0x1b6   : > { %s1569_s16 = smov %s1074_s17  ;;  %s1570_s17 = smov %s1321_s30 }
 0x1b7   : > { %s1571_s18 = smov %s1082_s19  ;;  %s1572_s19 = smov %s1086_s20 }
 0x1b8   : > { %s1573_s20 = smov %s1318_s8  ;;  %s1574_s21 = smov %s1098_s23 }
 0x1b9   : > { %s1575_s22 = smov %s1102_s24  ;;  %s1577_s24 = smov %s1583_s29 }
 0x1ba   : > { %s1576_s23 = smov %s1567_s12  ;;  %22 = sbr.rel (!%p20_p7) target bundleno = 16 (0x10), region = 108 }
 0x1c1   :  { %593 = vsyncpa [#allocation3], 1 }
 0x1c2   :  { %595 = vsyncpa [#allocation3 + $0x1], 1 }
 0x1c3   :  { %596 = vsyncpa [#allocation6], 1 }
 0x1c4   :  { %598 = vsyncpa [#allocation6 + $0x1], 1 }
 0x1c5   :  { %599 = vsyncpa [#allocation4], 1 }
 0x1c6   :  { %601 = vsyncpa [#allocation4 + $0x1], 1 }

</bundles_post_ra>
